<compile_context>
chip_gen: v7x
topology: tpu7x:2x2x1
jax: 0.10.0
libtpu: 0.0.40
codegen_flags: <defaults>
</compile_context>

<pallas_src>
import jax
import jax.numpy as jnp
from jax.experimental import pallas as pl
from jax.experimental.pallas import tpu as pltpu


def _round_up(x, m):
    return (x + m - 1) // m * m


def _cdiv(a, b):
    return -(-a // b)


def fold_bn(bn, eps=1e-5):
    """Inference-mode BN: (gamma, beta, mean, var) -> per-channel scale/bias."""
    gamma, beta, mean, var = bn
    scale = gamma / jnp.sqrt(var + eps)
    bias = beta - mean * scale
    return scale, bias


# ------------------------------ Pallas kernel ------------------------------ #

def _make_block_kernel(Cin_p, Cout_p, Wp, P_out, moff, ymargin, K2,
                       has_ds, is_last):
    # tap shifts on the flattened padded grid, dh-major / dw-minor order
    taps = [(dh - 1) * Wp + (dw - 1) for dh in range(3) for dw in range(3)]

    def kernel(x_ref, w1_ref, w2_ref, b1_ref, b2_ref, mask_ref, o_ref,
               im_ref, y1p_ref):
        # ---- im2col for conv1: 9 lane-shifted copies of the padded-flat x ----
        for t, sh in enumerate(taps):
            im_ref[t * Cin_p:(t + 1) * Cin_p, :] = \
                x_ref[0, :, moff + sh: moff + sh + P_out]
        # centre tap (sh == 0) is exactly the interior of x; load it now (as a
        # value, before im2col2 overwrites the buffer) and reuse it for the
        # residual branch instead of re-slicing x_ref.
        x_center = im_ref[4 * Cin_p:5 * Cin_p, :]

        # ---- conv1 (+BN1 scale folded) as ONE MXU dot, then bias + ReLU ------
        acc1 = jnp.dot(w1_ref[...], im_ref[:9 * Cin_p, :],
                       preferred_element_type=jnp.float32)
        # mask zeroes the 1-px conv border (== conv2's zero padding) and the
        # lane-padding tail of the flat grid.
        y1 = jnp.maximum(acc1 + b1_ref[...], 0.0) * mask_ref[...]

        # ---- stage y1 in the margin-bearing scratch --------------------------
        # only the small 128-aligned read margins are zeroed (the interior is
        # fully overwritten every step); all three stores are lane-aligned.
        y1p_ref[:, :ymargin] = jnp.zeros((Cout_p, ymargin), y1p_ref.dtype)
        y1p_ref[:, ymargin + P_out:] = jnp.zeros((Cout_p, ymargin), y1p_ref.dtype)
        y1p_ref[:, ymargin:ymargin + P_out] = y1.astype(y1p_ref.dtype)

        # ---- im2col for conv2 (+ downsample input folded in as extra K rows) -
        for t, sh in enumerate(taps):
            im_ref[t * Cout_p:(t + 1) * Cout_p, :] = \
                y1p_ref[:, ymargin + sh: ymargin + sh + P_out]
        if has_ds:
            im_ref[9 * Cout_p:9 * Cout_p + Cin_p, :] = x_center

        # ---- conv2 (+BN2, + folded 1x1-conv/BN downsample) as ONE MXU dot ----
        acc2 = jnp.dot(w2_ref[...], im_ref[:K2, :],
                       preferred_element_type=jnp.float32)
        out = acc2 + b2_ref[...]
        if not has_ds:
            out = out + x_center.astype(jnp.float32)   # identity residual

        out = jnp.tanh(out) if is_last else jnp.maximum(out, 0.0)
        o_ref[0] = out.astype(o_ref.dtype)

    return kernel


# -------------------------------- wrapper ----------------------------------- #

def basic_block_forward(x_nchw, p, stride=1, downsample=False, is_last=False,
                        compute_dtype=jnp.float32, out_dtype=None):
    """Fused Pallas BasicBlock forward.  x_nchw: (N, Cin, H, W) -> (N, Cout, H, W)."""
    if stride != 1:
        # TODO(synk): stride > 1 not implemented in the fused kernel.
        raise NotImplementedError("fused BasicBlock kernel supports stride=1 only")

    N, Cin, H, W = x_nchw.shape
    Cout = p['w1'].shape[-1]
    if not downsample and Cin != Cout:
        raise ValueError("identity residual requires Cin == Cout")

    cd = jnp.dtype(compute_dtype)
    od = jnp.dtype(out_dtype) if out_dtype is not None else cd

    # channel padding rounded to the dtype sublane tile (8 f32 / 16 bf16 rows
    # per vreg) so matmul operands and staging buffers stay fully packed.
    ctile = 8 * max(1, 4 // cd.itemsize)
    Cin_p = _round_up(Cin, ctile)
    Cout_p = _round_up(Cout, ctile)

    Hp, Wp = H + 2, W + 2
    P = Hp * Wp                        # conv-padded spatial grid, flattened
    P_out = _round_up(P, 128)          # lane-dense compute / store width
    margin = Wp + 1                    # max |tap shift| on the flat grid

    # ONE HBM padding pass: channel pad, the 1-px conv border, and the
    # lane-shift margins (TOP/BOT extra zero rows) for the in-kernel slices.
    TOP = 2                                        # TOP*Wp >= margin
    BOT = _cdiv(margin + (P_out - P), Wp)          # BOT*Wp >= margin + lane pad
    xpad = jnp.pad(x_nchw.astype(cd),
                   ((0, 0), (0, Cin_p - Cin), (1 + TOP, 1 + BOT), (1, 1)))
    L = (Hp + TOP + BOT) * Wp
    xflat = xpad.reshape(N, Cin_p, L)
    moff = TOP * Wp                                # flat offset of the grid start

    # ---- fold BN scales into conv weights (inference-mode BN) ----------------
    s1, b1 = fold_bn(p['bn1'])
    s2, b2 = fold_bn(p['bn2'])

    w1 = jnp.pad(p['w1'] * s1,
                 ((0, 0), (0, 0), (0, Cin_p - Cin), (0, Cout_p - Cout)))
    w1m = jnp.transpose(w1.reshape(9, Cin_p, Cout_p),
                        (2, 0, 1)).reshape(Cout_p, 9 * Cin_p)

    w2 = jnp.pad(p['w2'] * s2,
                 ((0, 0), (0, 0), (0, Cout_p - Cout), (0, Cout_p - Cout)))
    w2m = jnp.transpose(w2.reshape(9, Cout_p, Cout_p),
                        (2, 0, 1)).reshape(Cout_p, 9 * Cout_p)

    b2_total = b2
    if downsample:
        sds, bds = fold_bn(p['bn_ds'])
        wds = jnp.pad(p['wds'] * sds, ((0, Cin_p - Cin), (0, Cout_p - Cout)))
        # fold the 1x1 downsample conv (+ BN scale) into conv2's matmul
        w2m = jnp.concatenate([w2m, jnp.transpose(wds)], axis=1)
        b2_total = b2 + bds
    K2 = w2m.shape[1]

    b1v = jnp.pad(b1, (0, Cout_p - Cout)).reshape(Cout_p, 1).astype(jnp.float32)
    b2v = jnp.pad(b2_total, (0, Cout_p - Cout)).reshape(Cout_p, 1).astype(jnp.float32)

    # interior mask: 1 inside the H x W image, 0 on the conv border / lane pad
    hh = (jnp.arange(Hp) >= 1) & (jnp.arange(Hp) <= H)
    ww = (jnp.arange(Wp) >= 1) & (jnp.arange(Wp) <= W)
    mask = jnp.pad((hh[:, None] & ww[None, :]).reshape(P).astype(jnp.float32),
                   (0, P_out - P)).reshape(1, P_out)

    w1m = w1m.astype(cd)
    w2m = w2m.astype(cd)

    ymargin = _round_up(margin, 128)     # 128-aligned margins for the y1 stage
    R = max(9 * Cin_p, K2)               # im2col scratch rows (shared by both convs)

    kernel = _make_block_kernel(Cin_p, Cout_p, Wp, P_out, moff, ymargin, K2,
                                downsample, is_last)

    # rough per-step VMEM footprint (double-buffered ins/outs + scratch)
    est = 2 * (Cin_p * L * cd.itemsize
               + (Cout_p * 9 * Cin_p + Cout_p * K2) * cd.itemsize
               + Cout_p * P_out * od.itemsize
               + 8 * Cout_p + 4 * P_out) \
        + R * P_out * cd.itemsize \
        + Cout_p * (P_out + 2 * ymargin) * cd.itemsize
    vmem_limit = int(min(max(4 * est, 16 << 20), 48 << 20))

    out = pl.pallas_call(
        kernel,
        out_shape=jax.ShapeDtypeStruct((N, Cout_p, P_out), od),
        grid=(N,),
        in_specs=[
            pl.BlockSpec((1, Cin_p, L), lambda n: (n, 0, 0)),
            pl.BlockSpec((Cout_p, 9 * Cin_p), lambda n: (0, 0)),
            pl.BlockSpec((Cout_p, K2), lambda n: (0, 0)),
            pl.BlockSpec((Cout_p, 1), lambda n: (0, 0)),
            pl.BlockSpec((Cout_p, 1), lambda n: (0, 0)),
            pl.BlockSpec((1, P_out), lambda n: (0, 0)),
        ],
        out_specs=pl.BlockSpec((1, Cout_p, P_out), lambda n: (n, 0, 0)),
        scratch_shapes=[
            pltpu.VMEM((R, P_out), cd),                        # shared im2col
            pltpu.VMEM((Cout_p, P_out + 2 * ymargin), cd),     # y1 staging
        ],
        compiler_params=pltpu.CompilerParams(
            dimension_semantics=("parallel",),
            vmem_limit_bytes=vmem_limit),
    )(xflat, w1m, w2m, b1v, b2v, mask)

    # (N, Cout_p, P_out) padded flat grid -> NCHW, drop padded channels/border
    out = out[:, :Cout, :P].reshape(N, Cout, Hp, Wp)
    return out[:, :, 1:H + 1, 1:W + 1]


# ----------------------- pure-JAX reference (for check) --------------------- #

def basic_block_ref(x_nchw, p, stride=1, downsample=False, is_last=False):
    x = jnp.transpose(x_nchw, (0, 2, 3, 1))

    def bn(y, params):
        s, b = fold_bn(params)
        return y * s.reshape(1, 1, 1, -1) + b.reshape(1, 1, 1, -1)

    dn = ('NHWC', 'HWIO', 'NHWC')
    out = jax.lax.conv_general_dilated(x, p['w1'], (stride, stride),
                                       ((1, 1), (1, 1)), dimension_numbers=dn)
    out = jax.nn.relu(bn(out, p['bn1']))
    out = jax.lax.conv_general_dilated(out, p['w2'], (1, 1),
                                       ((1, 1), (1, 1)), dimension_numbers=dn)
    out = bn(out, p['bn2'])
    if downsample:
        wds = p['wds'].reshape(1, 1, *p['wds'].shape)
        ident = jax.lax.conv_general_dilated(x, wds, (stride, stride), 'VALID',
                                             dimension_numbers=dn)
        ident = bn(ident, p['bn_ds'])
    else:
        ident = x
    out = out + ident
    out = jnp.tanh(out) if is_last else jax.nn.relu(out)
    return jnp.transpose(out, (0, 3, 1, 2))


# ---------------------------- parameter setup ------------------------------- #

def _init_bn(keys, c):
    g = jax.random.normal(keys[0], (c,), jnp.float32) * 0.1 + 1.0
    b = jax.random.normal(keys[1], (c,), jnp.float32) * 0.1
    m = jax.random.normal(keys[2], (c,), jnp.float32) * 0.1
    v = jax.nn.softplus(jax.random.normal(keys[3], (c,), jnp.float32)) + 0.5
    return (g, b, m, v)


def init_block_params(key, cin, cout, downsample):
    ks = jax.random.split(key, 16)
    p = {
        'w1': jax.random.normal(ks[0], (3, 3, cin, cout), jnp.float32) * 0.2,
        'bn1': _init_bn(ks[1:5], cout),
        'w2': jax.random.normal(ks[5], (3, 3, cout, cout), jnp.float32) * 0.2,
        'bn2': _init_bn(ks[6:10], cout),
    }
    if downsample:
        p['wds'] = jax.random.normal(ks[10], (cin, cout), jnp.float32) * 0.2
        p['bn_ds'] = _init_bn(ks[11:15], cout)
    return p


# ---------------------------------- main ------------------------------------ #

if __name__ == "__main__":
    key = jax.random.PRNGKey(0)
    kx, k1, k2 = jax.random.split(key, 3)

    # small shapes: batch=2, inplanes=4, planes=8, spatial=16x16 (NCHW input)
    x = jax.random.normal(kx, (2, 4, 16, 16), jnp.float32)

    # block 1: channel-changing block with downsample branch (conv1x1 + BN)
    p1 = init_block_params(k1, 4, 8, downsample=True)
    # block 2: plain identity block with is_last=True (tanh output)
    p2 = init_block_params(k2, 8, 8, downsample=False)

    # f32 run (tight correctness check against the lax.conv reference)
    y1 = basic_block_forward(x, p1, stride=1, downsample=True, is_last=False)
    y2 = basic_block_forward(y1, p2, stride=1, downsample=False, is_last=True)
    y2 = jax.block_until_ready(y2)

    r1 = basic_block_ref(x, p1, stride=1, downsample=True, is_last=False)
    r2 = basic_block_ref(r1, p2, stride=1, downsample=False, is_last=True)

    assert jnp.allclose(y1, r1, atol=1e-3, rtol=1e-3), \
        f"block1 mismatch: {float(jnp.max(jnp.abs(y1 - r1)))}"
    assert jnp.allclose(y2, r2, atol=1e-3, rtol=1e-3), \
        f"block2 mismatch: {float(jnp.max(jnp.abs(y2 - r2)))}"

    # bf16 run (half the HBM/VMEM bytes, bf16 MXU path, f32 accumulation) —
    # loose sanity check only (activations/residual quantized to bf16).
    yb1 = basic_block_forward(x, p1, downsample=True, is_last=False,
                              compute_dtype=jnp.bfloat16)
    yb2 = basic_block_forward(yb1, p2, downsample=False, is_last=True,
                              compute_dtype=jnp.bfloat16)
    yb2 = jax.block_until_ready(yb2)
    assert bool(jnp.all(jnp.isfinite(yb2.astype(jnp.float32))))
    assert float(jnp.max(jnp.abs(yb2.astype(jnp.float32) - r2))) < 1.0, \
        "bf16 path grossly wrong"

    print("KERNEL_OK")
</pallas_src>

<mosaic_0001>
module attributes {stable_mosaic.version = 11 : i64} {
  func.func @kernel(%arg0: i32, %arg1: memref<1x8x450xf32, #tpu.memory_space<vmem>>, %arg2: memref<8x72xf32, #tpu.memory_space<vmem>>, %arg3: memref<8x80xf32, #tpu.memory_space<vmem>>, %arg4: memref<8x1xf32, #tpu.memory_space<vmem>>, %arg5: memref<8x1xf32, #tpu.memory_space<vmem>>, %arg6: memref<1x384xf32, #tpu.memory_space<vmem>>, %arg7: memref<1x8x384xf32, #tpu.memory_space<vmem>>, %arg8: memref<80x384xf32, #tpu.memory_space<vmem>>, %arg9: memref<8x640xf32, #tpu.memory_space<vmem>>) attributes {dimension_semantics = [#tpu.dimension_semantics<parallel>], iteration_bounds = array<i64: 2>, scalar_prefetch = 0 : i64, scratch_operands = 2 : i64, tpu.core_type = #tpu.core_type<tc>, window_params = [{transform_indices = @transform_0, window_bounds = array<i64: 1, 8, 450>}, {pipeline_mode = #tpu.pipeline_mode<synchronous>, transform_indices = @transform_1, window_bounds = array<i64: 8, 72>}, {pipeline_mode = #tpu.pipeline_mode<synchronous>, transform_indices = @transform_2, window_bounds = array<i64: 8, 80>}, {pipeline_mode = #tpu.pipeline_mode<synchronous>, transform_indices = @transform_3, window_bounds = array<i64: 8, 1>}, {pipeline_mode = #tpu.pipeline_mode<synchronous>, transform_indices = @transform_4, window_bounds = array<i64: 8, 1>}, {pipeline_mode = #tpu.pipeline_mode<synchronous>, transform_indices = @transform_5, window_bounds = array<i64: 1, 384>}, {transform_indices = @transform_6, window_bounds = array<i64: 1, 8, 384>}]} {
    %c0 = arith.constant 0 : index
    %c0_0 = arith.constant 0 : index
    %c17 = arith.constant 17 : index
    %0 = vector.load %arg1[%c0, %c0_0, %c17] : memref<1x8x450xf32, #tpu.memory_space<vmem>>, vector<1x8x384xf32>
    %1 = vector.shape_cast %0 : vector<1x8x384xf32> to vector<8x384xf32>
    %c0_1 = arith.constant 0 : index
    %c0_2 = arith.constant 0 : index
    %2 = vector.load %arg8[%c0_1, %c0_2] : memref<80x384xf32, #tpu.memory_space<vmem>>, vector<8x384xf32>
    tpu.vector_store %arg8[%c0_1, %c0_2], %1 {strides = array<i32>} : memref<80x384xf32, #tpu.memory_space<vmem>>, vector<8x384xf32>,
    %c0_3 = arith.constant 0 : index
    %c0_4 = arith.constant 0 : index
    %c18 = arith.constant 18 : index
    %3 = vector.load %arg1[%c0_3, %c0_4, %c18] : memref<1x8x450xf32, #tpu.memory_space<vmem>>, vector<1x8x384xf32>
    %4 = vector.shape_cast %3 : vector<1x8x384xf32> to vector<8x384xf32>
    %c8 = arith.constant 8 : index
    %c0_5 = arith.constant 0 : index
    %5 = vector.load %arg8[%c8, %c0_5] : memref<80x384xf32, #tpu.memory_space<vmem>>, vector<8x384xf32>
    tpu.vector_store %arg8[%c8, %c0_5], %4 {strides = array<i32>} : memref<80x384xf32, #tpu.memory_space<vmem>>, vector<8x384xf32>,
    %c0_6 = arith.constant 0 : index
    %c0_7 = arith.constant 0 : index
    %c19 = arith.constant 19 : index
    %6 = vector.load %arg1[%c0_6, %c0_7, %c19] : memref<1x8x450xf32, #tpu.memory_space<vmem>>, vector<1x8x384xf32>
    %7 = vector.shape_cast %6 : vector<1x8x384xf32> to vector<8x384xf32>
    %c16 = arith.constant 16 : index
    %c0_8 = arith.constant 0 : index
    %8 = vector.load %arg8[%c16, %c0_8] : memref<80x384xf32, #tpu.memory_space<vmem>>, vector<8x384xf32>
    tpu.vector_store %arg8[%c16, %c0_8], %7 {strides = array<i32>} : memref<80x384xf32, #tpu.memory_space<vmem>>, vector<8x384xf32>,
    %c0_9 = arith.constant 0 : index
    %c0_10 = arith.constant 0 : index
    %c35 = arith.constant 35 : index
    %9 = vector.load %arg1[%c0_9, %c0_10, %c35] : memref<1x8x450xf32, #tpu.memory_space<vmem>>, vector<1x8x384xf32>
    %10 = vector.shape_cast %9 : vector<1x8x384xf32> to vector<8x384xf32>
    %c24 = arith.constant 24 : index
    %c0_11 = arith.constant 0 : index
    %11 = vector.load %arg8[%c24, %c0_11] : memref<80x384xf32, #tpu.memory_space<vmem>>, vector<8x384xf32>
    tpu.vector_store %arg8[%c24, %c0_11], %10 {strides = array<i32>} : memref<80x384xf32, #tpu.memory_space<vmem>>, vector<8x384xf32>,
    %c0_12 = arith.constant 0 : index
    %c0_13 = arith.constant 0 : index
    %c36 = arith.constant 36 : index
    %12 = vector.load %arg1[%c0_12, %c0_13, %c36] : memref<1x8x450xf32, #tpu.memory_space<vmem>>, vector<1x8x384xf32>
    %13 = vector.shape_cast %12 : vector<1x8x384xf32> to vector<8x384xf32>
    %c32 = arith.constant 32 : index
    %c0_14 = arith.constant 0 : index
    %14 = vector.load %arg8[%c32, %c0_14] : memref<80x384xf32, #tpu.memory_space<vmem>>, vector<8x384xf32>
    tpu.vector_store %arg8[%c32, %c0_14], %13 {strides = array<i32>} : memref<80x384xf32, #tpu.memory_space<vmem>>, vector<8x384xf32>,
    %c0_15 = arith.constant 0 : index
    %c0_16 = arith.constant 0 : index
    %c37 = arith.constant 37 : index
    %15 = vector.load %arg1[%c0_15, %c0_16, %c37] : memref<1x8x450xf32, #tpu.memory_space<vmem>>, vector<1x8x384xf32>
    %16 = vector.shape_cast %15 : vector<1x8x384xf32> to vector<8x384xf32>
    %c40 = arith.constant 40 : index
    %c0_17 = arith.constant 0 : index
    %17 = vector.load %arg8[%c40, %c0_17] : memref<80x384xf32, #tpu.memory_space<vmem>>, vector<8x384xf32>
    tpu.vector_store %arg8[%c40, %c0_17], %16 {strides = array<i32>} : memref<80x384xf32, #tpu.memory_space<vmem>>, vector<8x384xf32>,
    %c0_18 = arith.constant 0 : index
    %c0_19 = arith.constant 0 : index
    %c53 = arith.constant 53 : index
    %18 = vector.load %arg1[%c0_18, %c0_19, %c53] : memref<1x8x450xf32, #tpu.memory_space<vmem>>, vector<1x8x384xf32>
    %19 = vector.shape_cast %18 : vector<1x8x384xf32> to vector<8x384xf32>
    %c48 = arith.constant 48 : index
    %c0_20 = arith.constant 0 : index
    %20 = vector.load %arg8[%c48, %c0_20] : memref<80x384xf32, #tpu.memory_space<vmem>>, vector<8x384xf32>
    tpu.vector_store %arg8[%c48, %c0_20], %19 {strides = array<i32>} : memref<80x384xf32, #tpu.memory_space<vmem>>, vector<8x384xf32>,
    %c0_21 = arith.constant 0 : index
    %c0_22 = arith.constant 0 : index
    %c54 = arith.constant 54 : index
    %21 = vector.load %arg1[%c0_21, %c0_22, %c54] : memref<1x8x450xf32, #tpu.memory_space<vmem>>, vector<1x8x384xf32>
    %22 = vector.shape_cast %21 : vector<1x8x384xf32> to vector<8x384xf32>
    %c56 = arith.constant 56 : index
    %c0_23 = arith.constant 0 : index
    %23 = vector.load %arg8[%c56, %c0_23] : memref<80x384xf32, #tpu.memory_space<vmem>>, vector<8x384xf32>
    tpu.vector_store %arg8[%c56, %c0_23], %22 {strides = array<i32>} : memref<80x384xf32, #tpu.memory_space<vmem>>, vector<8x384xf32>,
    %c0_24 = arith.constant 0 : index
    %c0_25 = arith.constant 0 : index
    %c55 = arith.constant 55 : index
    %24 = vector.load %arg1[%c0_24, %c0_25, %c55] : memref<1x8x450xf32, #tpu.memory_space<vmem>>, vector<1x8x384xf32>
    %25 = vector.shape_cast %24 : vector<1x8x384xf32> to vector<8x384xf32>
    %c64 = arith.constant 64 : index
    %c0_26 = arith.constant 0 : index
    %26 = vector.load %arg8[%c64, %c0_26] : memref<80x384xf32, #tpu.memory_space<vmem>>, vector<8x384xf32>
    tpu.vector_store %arg8[%c64, %c0_26], %25 {strides = array<i32>} : memref<80x384xf32, #tpu.memory_space<vmem>>, vector<8x384xf32>,
    %c32_27 = arith.constant 32 : index
    %c0_28 = arith.constant 0 : index
    %27 = vector.load %arg8[%c32_27, %c0_28] : memref<80x384xf32, #tpu.memory_space<vmem>>, vector<8x384xf32>
    %c0_29 = arith.constant 0 : index
    %c0_30 = arith.constant 0 : index
    %28 = vector.load %arg2[%c0_29, %c0_30] : memref<8x72xf32, #tpu.memory_space<vmem>>, vector<8x72xf32>
    %c0_31 = arith.constant 0 : index
    %c0_32 = arith.constant 0 : index
    %29 = vector.load %arg8[%c0_31, %c0_32] : memref<80x384xf32, #tpu.memory_space<vmem>>, vector<72x384xf32>
    %cst = arith.constant dense<0.000000e+00> : vector<8x384xf32>
    %30 = tpu.matmul %28, %29, %cst {dimension_numbers = #tpu.dot_dimension_numbers<[1], [0], [0], [1], [0, 0, 1, 1], [], []>} : vector<8x72xf32>, vector<72x384xf32>, vector<8x384xf32> -> vector<8x384xf32>
    %c0_33 = arith.constant 0 : index
    %c0_34 = arith.constant 0 : index
    %31 = vector.load %arg4[%c0_33, %c0_34] : memref<8x1xf32, #tpu.memory_space<vmem>>, vector<8x1xf32>
    %32 = vector.broadcast %31 : vector<8x1xf32> to vector<8x384xf32>
    %33 = arith.addf %30, %32 : vector<8x384xf32>
    %cst_35 = arith.constant 0.000000e+00 : f32
    %34 = vector.broadcast %cst_35 : f32 to vector<8x384xf32>
    %35 = arith.maximumf %33, %34 : vector<8x384xf32>
    %c0_36 = arith.constant 0 : index
    %c0_37 = arith.constant 0 : index
    %36 = vector.load %arg6[%c0_36, %c0_37] : memref<1x384xf32, #tpu.memory_space<vmem>>, vector<1x384xf32>
    %37 = vector.broadcast %36 : vector<1x384xf32> to vector<8x384xf32>
    %38 = arith.mulf %35, %37 : vector<8x384xf32>
    %cst_38 = arith.constant 0.000000e+00 : f32
    %39 = vector.broadcast %cst_38 : f32 to vector<8x128xf32>
    %c0_39 = arith.constant 0 : index
    %c0_40 = arith.constant 0 : index
    %40 = vector.load %arg9[%c0_39, %c0_40] : memref<8x640xf32, #tpu.memory_space<vmem>>, vector<8x128xf32>
    tpu.vector_store %arg9[%c0_39, %c0_40], %39 {strides = array<i32>} : memref<8x640xf32, #tpu.memory_space<vmem>>, vector<8x128xf32>,
    %cst_41 = arith.constant 0.000000e+00 : f32
    %41 = vector.broadcast %cst_41 : f32 to vector<8x128xf32>
    %c0_42 = arith.constant 0 : index
    %c512 = arith.constant 512 : index
    %42 = vector.load %arg9[%c0_42, %c512] : memref<8x640xf32, #tpu.memory_space<vmem>>, vector<8x128xf32>
    tpu.vector_store %arg9[%c0_42, %c512], %41 {strides = array<i32>} : memref<8x640xf32, #tpu.memory_space<vmem>>, vector<8x128xf32>,
    %c0_43 = arith.constant 0 : index
    %c128 = arith.constant 128 : index
    %43 = vector.load %arg9[%c0_43, %c128] : memref<8x640xf32, #tpu.memory_space<vmem>>, vector<8x384xf32>
    tpu.vector_store %arg9[%c0_43, %c128], %38 {strides = array<i32>} : memref<8x640xf32, #tpu.memory_space<vmem>>, vector<8x384xf32>,
    %c0_44 = arith.constant 0 : index
    %c109 = arith.constant 109 : index
    %44 = vector.load %arg9[%c0_44, %c109] : memref<8x640xf32, #tpu.memory_space<vmem>>, vector<8x384xf32>
    %c0_45 = arith.constant 0 : index
    %c0_46 = arith.constant 0 : index
    %45 = vector.load %arg8[%c0_45, %c0_46] : memref<80x384xf32, #tpu.memory_space<vmem>>, vector<8x384xf32>
    tpu.vector_store %arg8[%c0_45, %c0_46], %44 {strides = array<i32>} : memref<80x384xf32, #tpu.memory_space<vmem>>, vector<8x384xf32>,
    %c0_47 = arith.constant 0 : index
    %c110 = arith.constant 110 : index
    %46 = vector.load %arg9[%c0_47, %c110] : memref<8x640xf32, #tpu.memory_space<vmem>>, vector<8x384xf32>
    %c8_48 = arith.constant 8 : index
    %c0_49 = arith.constant 0 : index
    %47 = vector.load %arg8[%c8_48, %c0_49] : memref<80x384xf32, #tpu.memory_space<vmem>>, vector<8x384xf32>
    tpu.vector_store %arg8[%c8_48, %c0_49], %46 {strides = array<i32>} : memref<80x384xf32, #tpu.memory_space<vmem>>, vector<8x384xf32>,
    %c0_50 = arith.constant 0 : index
    %c111 = arith.constant 111 : index
    %48 = vector.load %arg9[%c0_50, %c111] : memref<8x640xf32, #tpu.memory_space<vmem>>, vector<8x384xf32>
    %c16_51 = arith.constant 16 : index
    %c0_52 = arith.constant 0 : index
    %49 = vector.load %arg8[%c16_51, %c0_52] : memref<80x384xf32, #tpu.memory_space<vmem>>, vector<8x384xf32>
    tpu.vector_store %arg8[%c16_51, %c0_52], %48 {strides = array<i32>} : memref<80x384xf32, #tpu.memory_space<vmem>>, vector<8x384xf32>,
    %c0_53 = arith.constant 0 : index
    %c127 = arith.constant 127 : index
    %50 = vector.load %arg9[%c0_53, %c127] : memref<8x640xf32, #tpu.memory_space<vmem>>, vector<8x384xf32>
    %c24_54 = arith.constant 24 : index
    %c0_55 = arith.constant 0 : index
    %51 = vector.load %arg8[%c24_54, %c0_55] : memref<80x384xf32, #tpu.memory_space<vmem>>, vector<8x384xf32>
    tpu.vector_store %arg8[%c24_54, %c0_55], %50 {strides = array<i32>} : memref<80x384xf32, #tpu.memory_space<vmem>>, vector<8x384xf32>,
    %c0_56 = arith.constant 0 : index
    %c128_57 = arith.constant 128 : index
    %52 = vector.load %arg9[%c0_56, %c128_57] : memref<8x640xf32, #tpu.memory_space<vmem>>, vector<8x384xf32>
    %c32_58 = arith.constant 32 : index
    %c0_59 = arith.constant 0 : index
    %53 = vector.load %arg8[%c32_58, %c0_59] : memref<80x384xf32, #tpu.memory_space<vmem>>, vector<8x384xf32>
    tpu.vector_store %arg8[%c32_58, %c0_59], %52 {strides = array<i32>} : memref<80x384xf32, #tpu.memory_space<vmem>>, vector<8x384xf32>,
    %c0_60 = arith.constant 0 : index
    %c129 = arith.constant 129 : index
    %54 = vector.load %arg9[%c0_60, %c129] : memref<8x640xf32, #tpu.memory_space<vmem>>, vector<8x384xf32>
    %c40_61 = arith.constant 40 : index
    %c0_62 = arith.constant 0 : index
    %55 = vector.load %arg8[%c40_61, %c0_62] : memref<80x384xf32, #tpu.memory_space<vmem>>, vector<8x384xf32>
    tpu.vector_store %arg8[%c40_61, %c0_62], %54 {strides = array<i32>} : memref<80x384xf32, #tpu.memory_space<vmem>>, vector<8x384xf32>,
    %c0_63 = arith.constant 0 : index
    %c145 = arith.constant 145 : index
    %56 = vector.load %arg9[%c0_63, %c145] : memref<8x640xf32, #tpu.memory_space<vmem>>, vector<8x384xf32>
    %c48_64 = arith.constant 48 : index
    %c0_65 = arith.constant 0 : index
    %57 = vector.load %arg8[%c48_64, %c0_65] : memref<80x384xf32, #tpu.memory_space<vmem>>, vector<8x384xf32>
    tpu.vector_store %arg8[%c48_64, %c0_65], %56 {strides = array<i32>} : memref<80x384xf32, #tpu.memory_space<vmem>>, vector<8x384xf32>,
    %c0_66 = arith.constant 0 : index
    %c146 = arith.constant 146 : index
    %58 = vector.load %arg9[%c0_66, %c146] : memref<8x640xf32, #tpu.memory_space<vmem>>, vector<8x384xf32>
    %c56_67 = arith.constant 56 : index
    %c0_68 = arith.constant 0 : index
    %59 = vector.load %arg8[%c56_67, %c0_68] : memref<80x384xf32, #tpu.memory_space<vmem>>, vector<8x384xf32>
    tpu.vector_store %arg8[%c56_67, %c0_68], %58 {strides = array<i32>} : memref<80x384xf32, #tpu.memory_space<vmem>>, vector<8x384xf32>,
    %c0_69 = arith.constant 0 : index
    %c147 = arith.constant 147 : index
    %60 = vector.load %arg9[%c0_69, %c147] : memref<8x640xf32, #tpu.memory_space<vmem>>, vector<8x384xf32>
    %c64_70 = arith.constant 64 : index
    %c0_71 = arith.constant 0 : index
    %61 = vector.load %arg8[%c64_70, %c0_71] : memref<80x384xf32, #tpu.memory_space<vmem>>, vector<8x384xf32>
    tpu.vector_store %arg8[%c64_70, %c0_71], %60 {strides = array<i32>} : memref<80x384xf32, #tpu.memory_space<vmem>>, vector<8x384xf32>,
    %c72 = arith.constant 72 : index
    %c0_72 = arith.constant 0 : index
    %62 = vector.load %arg8[%c72, %c0_72] : memref<80x384xf32, #tpu.memory_space<vmem>>, vector<8x384xf32>
    tpu.vector_store %arg8[%c72, %c0_72], %27 {strides = array<i32>} : memref<80x384xf32, #tpu.memory_space<vmem>>, vector<8x384xf32>,
    %c0_73 = arith.constant 0 : index
    %c0_74 = arith.constant 0 : index
    %63 = vector.load %arg3[%c0_73, %c0_74] : memref<8x80xf32, #tpu.memory_space<vmem>>, vector<8x80xf32>
    %c0_75 = arith.constant 0 : index
    %c0_76 = arith.constant 0 : index
    %64 = vector.load %arg8[%c0_75, %c0_76] : memref<80x384xf32, #tpu.memory_space<vmem>>, vector<80x384xf32>
    %cst_77 = arith.constant dense<0.000000e+00> : vector<8x384xf32>
    %65 = tpu.matmul %63, %64, %cst_77 {dimension_numbers = #tpu.dot_dimension_numbers<[1], [0], [0], [1], [0, 0, 1, 1], [], []>} : vector<8x80xf32>, vector<80x384xf32>, vector<8x384xf32> -> vector<8x384xf32>
    %c0_78 = arith.constant 0 : index
    %c0_79 = arith.constant 0 : index
    %66 = vector.load %arg5[%c0_78, %c0_79] : memref<8x1xf32, #tpu.memory_space<vmem>>, vector<8x1xf32>
    %67 = vector.broadcast %66 : vector<8x1xf32> to vector<8x384xf32>
    %68 = arith.addf %65, %67 : vector<8x384xf32>
    %cst_80 = arith.constant 0.000000e+00 : f32
    %69 = vector.broadcast %cst_80 : f32 to vector<8x384xf32>
    %70 = arith.maximumf %68, %69 : vector<8x384xf32>
    %c0_81 = arith.constant 0 : index
    %c0_82 = arith.constant 0 : index
    %c0_83 = arith.constant 0 : index
    %71 = vector.load %arg7[%c0_81, %c0_82, %c0_83] : memref<1x8x384xf32, #tpu.memory_space<vmem>>, vector<1x8x384xf32>
    %72 = vector.shape_cast %71 : vector<1x8x384xf32> to vector<8x384xf32>
    %73 = vector.shape_cast %70 : vector<8x384xf32> to vector<1x8x384xf32>
    tpu.vector_store %arg7[%c0_81, %c0_82, %c0_83], %73 {strides = array<i32>} : memref<1x8x384xf32, #tpu.memory_space<vmem>>, vector<1x8x384xf32>,
    return
  }
  func.func @transform_0(%arg0: i32) -> (i32, i32, i32) {
    %c0_i32 = arith.constant 0 : i32
    %c0_i32_0 = arith.constant 0 : i32
    %c0_i32_1 = arith.constant 0 : i32
    return %arg0, %c0_i32, %c0_i32_0 : i32, i32, i32
  }
  func.func @transform_1(%arg0: i32) -> (i32, i32) {
    %c0_i32 = arith.constant 0 : i32
    %c0_i32_0 = arith.constant 0 : i32
    %c0_i32_1 = arith.constant 0 : i32
    return %c0_i32, %c0_i32_0 : i32, i32
  }
  func.func @transform_2(%arg0: i32) -> (i32, i32) {
    %c0_i32 = arith.constant 0 : i32
    %c0_i32_0 = arith.constant 0 : i32
    %c0_i32_1 = arith.constant 0 : i32
    return %c0_i32, %c0_i32_0 : i32, i32
  }
  func.func @transform_3(%arg0: i32) -> (i32, i32) {
    %c0_i32 = arith.constant 0 : i32
    %c0_i32_0 = arith.constant 0 : i32
    %c0_i32_1 = arith.constant 0 : i32
    return %c0_i32, %c0_i32_0 : i32, i32
  }
  func.func @transform_4(%arg0: i32) -> (i32, i32) {
    %c0_i32 = arith.constant 0 : i32
    %c0_i32_0 = arith.constant 0 : i32
    %c0_i32_1 = arith.constant 0 : i32
    return %c0_i32, %c0_i32_0 : i32, i32
  }
  func.func @transform_5(%arg0: i32) -> (i32, i32) {
    %c0_i32 = arith.constant 0 : i32
    %c0_i32_0 = arith.constant 0 : i32
    %c0_i32_1 = arith.constant 0 : i32
    return %c0_i32, %c0_i32_0 : i32, i32
  }
  func.func @transform_6(%arg0: i32) -> (i32, i32, i32) {
    %c0_i32 = arith.constant 0 : i32
    %c0_i32_0 = arith.constant 0 : i32
    %c0_i32_1 = arith.constant 0 : i32
    return %arg0, %c0_i32, %c0_i32_0 : i32, i32, i32
  }
}

</mosaic_0001>

<bundles_post_ra>
// kernel: tpu_custom_call.1
= control target key start
LH: loop header
LB: loop body
LE: loop exit
PB: predicated region body
PF: predicated region fallthrough
CT: control target
= control target key end

     0   :  { %11 = vsyncpa [#allocation5], 0  ;;  %s2009_s0 = inlined_call_operand.hbm [shape: f32[2,8,450], index: 0, kind: input, shape index: {}]   ;;  %s2010_s1 = inlined_call_operand.vmem [shape: f32[8,72], index: 1, kind: input, shape index: {}]   ;;  %s2011_s2 = inlined_call_operand.vmem [shape: f32[8,80], index: 2, kind: input, shape index: {}]   ;;  %s2012_s3 = inlined_call_operand.vmem [shape: f32[8,1], index: 3, kind: input, shape index: {}]   ;;  %s2013_s4 = inlined_call_operand.vmem [shape: f32[8,1], index: 4, kind: input, shape index: {}]   ;;  %s2014_s5 = inlined_call_operand.vmem [shape: f32[1,384], index: 5, kind: input, shape index: {}]   ;;  %s2015_s6 = inlined_call_operand.hbm [shape: f32[2,8,384], index: 6, kind: output, shape index: {}]  }
   0x1   :  { %13 = vsyncpa [#allocation5 + $0x1], 0 }
   0x2   :  { %14 = vsyncpa [#allocation6], 0 }
   0x3   :  { %16 = vsyncpa [#allocation6 + $0x1], 0  ;;  %s1720_s21 = smov 0   ;;  %s1722_s22 = smov 0  }
   0x4   :  { %s1724_s23 = smov 0   ;;  %s1726_s24 = smov 0  }
   0x5 LB: > { %s1741_s25 = sadd.s32 4294967295, %s1663_s24   ;;  %s1196_s26 = sadd.s32 4294967294, %s1663_s24   ;;  %s1663_s24 = sphi %s1726_s24, %s2030_s24   ;;  %s1659_s23 = sphi %s1724_s23, %s2029_s23   ;;  %s1655_s22 = sphi %s1722_s22, %s2028_s22   ;;  %s1651_s21 = sphi %s1720_s21, %s2027_s21  }
   0x6   : > { %s1745_s27 = sadd.s32 1, %s1663_s24   ;;  %s29_s28 = sadd.s32 1, %s1659_s23 }
   0x7   : > { %s26_s29 = ssub.s32 %s1663_s24, %s1745_s27  ;;  %p36_p0 = scmp.ne.s32.totalorder %s1659_s23, %s1655_s22 }
   0x8   : > { %p27_p1 = scmp.eq.s32.totalorder %s26_s29, 0  ;;  %p37_p2 = scmp.eq.s32.totalorder %s1663_s24, 0 }
   0x9   : > { %p42_p3 = scmp.ne.s32.totalorder %s1655_s22, %s1651_s21  ;;  %p43_p4 = scmp.eq.s32.totalorder %s1741_s25, 0 }
   0xa   : > { %s1757_s30 = scalar_select %p27_p1, %s1659_s23, %s29_s28  }
   0xb   : > { %p1759_p5 = por %p37_p2, %p36_p0  ;;  %p1763_p6 = por %p43_p4, %p42_p3 }
   0xc   : > { %p171_p7 = scmp.eq.s32.totalorder %s1741_s25, 1  ;;  %p177_p8 = scmp.eq.s32.totalorder %s1196_s26, 1 }
   0xd   : > { %p1354_p10 = scmp.lt.s32.totalorder %s1663_s24, 2  ;;  %s212_s11 = sand.u32 1, %s1659_s23  }
   0xe   : > { %p1770_p11 = por %p171_p7, %p36_p0  ;;  %p1774_p12 = por %p177_p8, %p42_p3 }
   0xf   : > { %s1211_s12 = sshll.u32 %s1663_s24, 9  ;;  %s1199_s13 = sshll.u32 %s212_s11, 5 }
  0x10   : > { %s2019_s9 = scalar_select %p1770_p11, 1, 0 }
  0x11   : > { %s2020_s10 = scalar_select %p1774_p12, 1, 0 }
  0x12   : > { %s1783_s16 = scalar_lea.hbm %s2009_s0, %s1211_s12  ;;  %s216_s17 = scalar_lea.vmem [#allocation4], %s1199_s13 }
  0x13   : > { %s224_s18 = sshll.u32 %s216_s17, 4  ;;  %p1787_p13 = pnand %p1354_p10, %p1759_p5  ;;  %s1791_s18 = int_to_ptr.vmem [resolvable:$true] %s224_s18 }
  0x14   : > { %s213_s20 = scalar_lea.sflag [#allocation5], %s212_s11  ;;  %s1567_s26 = scalar_lea.hbm %s1783_s16, 512 }
  0x15   : > { %p1568_p2 = scmp.ne.s32.totalorder %s1783_s16, %s1567_s26  ;;  %p1569_p3 = pneg %p1787_p13 }
  0x16   : > { %s1572_s7 = scalar_lea.hbm %s2009_s0, 1024  ;;  %p1573_p5 = scmp.lt.u32.totalorder %s1783_s16, %s2009_s0 }
  0x17   : > { %p1570_p4 = pnand %p1569_p3, %p1568_p2  ;;  %p1574_p8 = scmp.lt.u32.totalorder %s1572_s7, %s1567_s26 }
  0x18   : > { %p1576_p9 = scmp.lt.u32.totalorder %s1567_s26, %s1783_s16 }
  0x19   : > { %p1571_p7 = pneg %p1570_p4  ;;  %p1575_p10 = por %p1574_p8, %p1573_p5 }
  0x1b   : > { %p1577_p0 = por %p1576_p9, %p1575_p10 }
  0x1d   : > { %p1578_p1 = pnand %p1577_p0, %p1571_p7 }
  0x1f   : > { %1581 = shalt.err (!%p1578_p1)
}
  0x20   : > { %s1582_s11 = scalar_lea.vmem %s1791_s18, 512  ;;  %s1665_s14 = smov [#allocation4]  }
  0x21   : > { %p1583_p2 = scmp.ne.s32.totalorder %s1791_s18, %s1582_s11  ;;  %s1587_s15 = sshll.u32 %s1665_s14, 4  ;;  %s1588_s15 = int_to_ptr.vmem [resolvable:$false] %s1587_s15 }
  0x22   : > { %s1589_s17 = scalar_lea.vmem %s1588_s15, 1024  ;;  %p1590_p11 = scmp.lt.s32.totalorder %s1791_s18, %s1588_s15 }
  0x23   : > { %p1585_p4 = pnand %p1583_p2, %p1569_p3  ;;  %p1591_p5 = scmp.lt.s32.totalorder %s1589_s17, %s1582_s11 }
  0x25   : > { %p1586_p12 = pneg %p1585_p4  ;;  %p1592_p8 = por %p1591_p5, %p1590_p11 }
  0x27   : > { %p1593_p9 = pnand %p1592_p8, %p1586_p12 }
  0x29   : > { %1596 = shalt.err (!%p1593_p9)
}
  0x2a   : > { %1349 = dma.hbm_to_vmem [thread:$0]  (!%p1787_p13), %s1783_s16, 512, %s1791_s18, %s213_s20  }
  0x2b   : > { %p2022_p0 = scmp.lt.s32.totalorder %s1663_s24, 3  ;;  %p2023_p1 = scmp.ge.s32.totalorder %s1663_s24, 1 }
  0x2d   : > { %p230_p3 = pnand %p2023_p1, %p2022_p0 }
  0x2e   : > { %s1825_s26 = sand.u32 (!%p230_p3), 1, %s1655_s22  }
  0x2f   : > { %233 = sbr.rel (%p230_p3) target bundleno = 818 (0x332), region = 44  ;;  %s1203_s28 = sshll.u32 (!%p230_p3), %s1825_s26, 5 }
  0x30   : > { %s236_s29 = scalar_lea.sflag (!%p230_p3), [#allocation5], %s1825_s26  ;;  %s239_s7 = scalar_lea.vmem (!%p230_p3), [#allocation4], %s1203_s28 }
  0x36   : > { %1642 = dma.done.wait (%p1763_p6), %s236_s29, 512  }
  0x37   : > { %1644 = vsyncadd (%p1763_p6), %s236_s29, 4294966784  ;;  %v1666_v0 = vmov 0.0|0.0   ;;  %v269_v1 = vld [vmem:[%s239_s7 + $0x8] sm:$0xff]  ;;  %v270_v2 = vld [vmem:[%s239_s7 + $0x10] sm:$0xff]  ;;  %s1667_s16 = smov 111   ;;  %s1668_s18 = smov 110  }
  0x38   : > { %1293 = vmatprep.subr.bf16.mxu1 %v1666_v0  ;;  %v268_v3 = vld [vmem:[%s239_s7] sm:$0xff]  ;;  %v1406_v4 = vpack.i.bf16 %v270_v2, %v269_v1  ;;  %v271_v5 = vld [vmem:[%s239_s7 + $0x18] sm:$0xff]  ;;  %s1669_s8 = smov 109   ;;  %s1670_s19 = smov 93   ;;  %v1674_v7 = vmov 0.0   ;;  %vm1676_vm0 = vmmov 0  }
  0x39   : > { %v1416_v6 = vpack.i.bf16 %v271_v5, %v268_v3  ;;  %s1671_s20 = smov 92   ;;  %s1672_s12 = smov 91   ;;  %604 = vmatprep.mubr.f32.mxu0 %v1674_v7  ;;  %1251 = vmatprep.mubr.msk.f32.mxu1 %vm1676_vm0, %v1674_v7  ;;  %v1677_v8 = vmov 0   ;;  %v530_v9 = vld [vmem:[%s2012_s3] sm:$0xff]  ;;  %vm284_vm1 = vcmask 908288   ;;  %vm310_vm2 = vcmask 900096  }
  0x3a   : > { %1407 = vrot.lane.b32.xlu0 %v1406_v4, %s1667_s16  ;;  %s1673_s13 = smov 75   ;;  %s1675_s11 = smov 74   ;;  %vm336_vm3 = vcmask 891904   ;;  %vm362_vm4 = vcmask 760832   ;;  %vm388_vm5 = vcmask 752640   ;;  %vm414_vm6 = vcmask 744448  }
  0x3b   : > { %1417 = vrot.lane.b32.xlu1 %v1416_v6, %s1667_s16  ;;  %1486 = vset.pattern.permute.xlu0 %v1677_v8  ;;  %s1678_s14 = smov 73   ;;  %vm440_vm7 = vcmask 613376   ;;  %vm466_vm8 = vcmask 605184   ;;  %vm492_vm9 = vcmask 596992   ;;  %vm536_vm10 = vcmask 588800   ;;  %s1341_s28 = smul.u32 384, %s1741_s25 }
  0x3c   : > { %vm777_vm11 = vcmask 138240   ;;  %vm725_vm12 = vcmask 154624   ;;  %vm751_vm13 = vcmask 146432   ;;  %vm803_vm14 = vcmask 7168   ;;  %s1112_s25 = scalar_lea.sflag [#allocation6], %s1825_s26  ;;  %p2024_p11 = scmp.ne.s32.totalorder %s2019_s9, 0 }
  0x3d   : > { %vm835_vm15 = vcmask 1039360  }
  0x3e   : > { %1412 = vrot.lane.b32.xlu0 %v1406_v4, %s1668_s18 }
  0x3f   : > { %1422 = vrot.lane.b32.xlu1 %v1416_v6, %s1668_s18 }
  0x42   : > { %1427 = vrot.lane.b32.xlu0 %v1406_v4, %s1669_s8 }
  0x43   : > { %1432 = vrot.lane.b32.xlu1 %v1406_v4, %s1670_s19 }
  0x46   : > { %1437 = vrot.lane.b32.xlu0 %v1416_v6, %s1669_s8 }
  0x47   : > { %1442 = vrot.lane.b32.xlu1 %v1416_v6, %s1670_s19 }
  0x4a   : > { %1447 = vrot.lane.b32.xlu0 %v1406_v4, %s1671_s20 }
  0x4b   : > { %1452 = vrot.lane.b32.xlu1 %v1406_v4, %s1672_s12 }
  0x4e   : > { %1457 = vrot.lane.b32.xlu0 %v1416_v6, %s1671_s20  ;;  %s1679_s20 = smov 18  }
  0x4f   : > { %1462 = vrot.lane.b32.xlu1 %v1416_v6, %s1672_s12  ;;  %s1680_s12 = smov 19  }
  0x52   : > { %1467 = vrot.lane.b32.xlu0 %v1406_v4, %s1673_s13 }
  0x53   : > { %1472 = vrot.lane.b32.xlu1 %v1406_v4, %s1675_s11 }
  0x56   : > { %1477 = vrot.lane.b32.xlu0 %v1416_v6, %s1673_s13  ;;  %s1681_s13 = smov 1  }
  0x57   : > { %1482 = vrot.lane.b32.xlu1 %v1416_v6, %s1675_s11  ;;  %s1682_s11 = smov 17  }
  0x5a   : > { %486 = vrot.lane.b32.xlu0 %v269_v1, %s1678_s14 }
  0x5b   : > { %488 = vrot.lane.b32.xlu1 %v270_v2, %s1678_s14 }
  0x5e   : > { %484 = vrot.lane.b32.xlu0 %v268_v3, %s1678_s14 }
  0x5f   : > { %490 = vrot.lane.b32.xlu1 %v271_v5, %s1678_s14  ;;  %s1683_s14 = smov 127  }
  0x62   : > { %533 = vperm.xlu0 %1486, %v530_v9  }
  0xac   : > { %v1408_v10 = vpop.permute.xlu0 %1407 }
  0xad   : > { %v1418_v11 = vpop.permute.xlu1 %1417  ;;  %v1410_v12 = vunpack.i.h.bf16 %v1408_v10  ;;  %v1409_v13 = vunpack.i.l.bf16 %v1408_v10 }
  0xae   : > { %v1420_v14 = vunpack.i.h.bf16 %v1418_v11  ;;  %v1419_v15 = vunpack.i.l.bf16 %v1418_v11 }
  0xaf   : > { %v286_v22 = vsel %vm284_vm1, %v1409_v13, %v1410_v12 }
  0xb0   : > { %v1413_v16 = vpop.permute.xlu0 %1412  ;;  %v287_v24 = vsel %vm284_vm1, %v1410_v12, %v1420_v14  ;;  %v285_v28 = vsel %vm284_vm1, %v1419_v15, %v1409_v13 }
  0xb1   : > { %v1415_v17 = vunpack.i.h.bf16 %v1413_v16  ;;  %v1414_v18 = vunpack.i.l.bf16 %v1413_v16  ;;  %v1423_v19 = vpop.permute.xlu1 %1422 }
  0xb2   : > { %v1425_v20 = vunpack.i.h.bf16 %v1423_v19  ;;  %v1424_v21 = vunpack.i.l.bf16 %v1423_v19 }
  0xb3   : > { %v312_v23 = vsel %vm310_vm2, %v1414_v18, %v1415_v17 }
  0xb4   : > { %v1428_v25 = vpop.permute.xlu0 %1427  ;;  %v1277_v26 = vpack.c.bf16 %v312_v23, %v286_v22  ;;  %v313_v27 = vsel %vm310_vm2, %v1415_v17, %v1425_v20  ;;  %v311_v29 = vsel %vm310_vm2, %v1424_v21, %v1414_v18 }
  0xb5   : > { %v1430_v30 = vunpack.i.h.bf16 %v1428_v25  ;;  %v1429_v31 = vunpack.i.l.bf16 %v1428_v25  ;;  %v1433_v32 = vpop.permute.xlu1 %1432  ;;  %v1294_v33 = vpack.c.bf16 %v313_v27, %v287_v24  ;;  %v1279_v34 = vpack.c.bf16 %v311_v29, %v285_v28 }
  0xb6   : > { %v1435_v35 = vunpack.i.h.bf16 %v1433_v32  ;;  %v1434_v36 = vunpack.i.l.bf16 %v1433_v32  ;;  %1278 = vmatprep.subr.bf16.mxu0 %v1277_v26 }
  0xb7   : > { %1295 = vmatpush3.bf16.msra.mxu1 %v1294_v33  ;;  %1280 = vmatpush1.bf16.msra.mxu0 %v1279_v34  ;;  %v338_v37 = vsel %vm336_vm3, %v1429_v31, %v1430_v30 }
  0xb8   : > { %v1438_v38 = vpop.permute.xlu0 %1437  ;;  %v364_v39 = vsel %vm362_vm4, %v1434_v36, %v1435_v35  ;;  %1296 = vmatprep.subr.bf16.mxu1 %v1666_v0 }
  0xb9   : > { %v1440_v40 = vunpack.i.h.bf16 %v1438_v38  ;;  %v1439_v41 = vunpack.i.l.bf16 %v1438_v38  ;;  %v1443_v42 = vpop.permute.xlu1 %1442  ;;  %v1281_v43 = vpack.c.bf16 %v364_v39, %v338_v37  ;;  %v505_v38 = vld [vmem:[%s2010_s1] sm:$0xff] }
  0xba   : > { %v1445_v44 = vunpack.i.h.bf16 %v1443_v42  ;;  %v1444_v45 = vunpack.i.l.bf16 %v1443_v42 }
  0xbb   : > { %1282 = vmatprep.subr.bf16.mxu0 %v1281_v43  ;;  %v337_v46 = vsel %vm336_vm3, %v1439_v41, %v1429_v31  ;;  %v339_v47 = vsel %vm336_vm3, %v1430_v30, %v1440_v40  ;;  %v686_v40 = vlaneseq }
  0xbc   : > { %v1448_v48 = vpop.permute.xlu0 %1447  ;;  %v363_v49 = vsel %vm362_vm4, %v1444_v45, %v1434_v36  ;;  %v365_v50 = vsel %vm362_vm4, %v1435_v35, %v1445_v44  ;;  %v684_v44 = vld [vmem:[%s2014_s5] sm:$0x7] }
  0xbd   : > { %v1450_v51 = vunpack.i.h.bf16 %v1448_v48  ;;  %v1449_v52 = vunpack.i.l.bf16 %v1448_v48  ;;  %v1453_v53 = vpop.permute.xlu1 %1452  ;;  %v1283_v54 = vpack.c.bf16 %v363_v49, %v337_v46  ;;  %v1297_v55 = vpack.c.bf16 %v365_v50, %v339_v47 }
  0xbe   : > { %v1455_v56 = vunpack.i.h.bf16 %v1453_v53  ;;  %v1454_v57 = vunpack.i.l.bf16 %v1453_v53  ;;  %v687_v41 = vshrl.u32 %v686_v40, 7 }
  0xbf   : > { %1284 = vmatpush1.bf16.msra.mxu0 %v1283_v54  ;;  %1298 = vmatpush3.bf16.msra.mxu1 %v1297_v55  ;;  %v1860_v58 = vsel %vm388_vm5, %v1449_v52, %v1450_v51 }
  0xc0   : > { %v1458_v59 = vpop.permute.xlu0 %1457  ;;  %v416_v60 = vsel %vm414_vm6, %v1454_v57, %v1455_v56  ;;  %1299 = vmatprep.subr.bf16.mxu1 %v1666_v0  ;;  %v696_v42 = vsub.s32 2, %v687_v41 }
  0xc1   : > { %v1460_v61 = vunpack.i.h.bf16 %v1458_v59  ;;  %v1459_v62 = vunpack.i.l.bf16 %v1458_v59  ;;  %v1463_v63 = vpop.permute.xlu1 %1462  ;;  %v1285_v1 = vpack.c.bf16 %v416_v60, %v1860_v58 }
  0xc2   : > { %v1465_v2 = vunpack.i.h.bf16 %v1463_v63  ;;  %v1464_v3 = vunpack.i.l.bf16 %v1463_v63  ;;  %v697_v48 = vrot.slane %v684_v44, %v696_v42 }
  0xc3   : > { %1286 = vmatprep.subr.bf16.mxu0 %v1285_v1  ;;  %v1866_v4 = vsel %vm388_vm5, %v1459_v62, %v1449_v52  ;;  %v1869_v5 = vsel %vm388_vm5, %v1450_v51, %v1460_v61  ;;  %v688_v51 = vsub.s32 0, %v687_v41  ;;  %v692_v52 = vsub.s32 1, %v687_v41 }
  0xc4   : > { %v1468_v6 = vpop.permute.xlu0 %1467  ;;  %v415_v8 = vsel %vm414_vm6, %v1464_v3, %v1454_v57  ;;  %v417_v9 = vsel %vm414_vm6, %v1455_v56, %v1465_v2 }
  0xc5   : > { %v1470_v10 = vunpack.i.h.bf16 %v1468_v6  ;;  %v1469_v11 = vunpack.i.l.bf16 %v1468_v6  ;;  %v1473_v12 = vpop.permute.xlu1 %1472  ;;  %v1287_v13 = vpack.c.bf16 %v415_v8, %v1866_v4  ;;  %v1300_v14 = vpack.c.bf16 %v417_v9, %v1869_v5 }
  0xc6   : > { %v1475_v15 = vunpack.i.h.bf16 %v1473_v12  ;;  %v1474_v16 = vunpack.i.l.bf16 %v1473_v12  ;;  %v689_v57 = vrot.slane %v684_v44, %v688_v51  ;;  %v693_v59 = vrot.slane %v684_v44, %v692_v52 }
  0xc7   : > { %1288 = vmatpush1.bf16.msra.mxu0 %v1287_v13  ;;  %1301 = vmatpush3.bf16.msra.mxu1 %v1300_v14  ;;  %v442_v17 = vsel %vm440_vm7, %v1469_v11, %v1470_v10 }
  0xc8   : > { %v1478_v18 = vpop.permute.xlu0 %1477  ;;  %v468_v19 = vsel %vm466_vm8, %v1474_v16, %v1475_v15  ;;  %1302 = vmatprep.subr.bf16.mxu1 %v1666_v0 }
  0xc9   : > { %v1480_v20 = vunpack.i.h.bf16 %v1478_v18  ;;  %v1479_v21 = vunpack.i.l.bf16 %v1478_v18  ;;  %v1483_v22 = vpop.permute.xlu1 %1482  ;;  %v1289_v23 = vpack.c.bf16 %v468_v19, %v442_v17 }
  0xca   : > { %v1485_v24 = vunpack.i.h.bf16 %v1483_v22  ;;  %v1484_v25 = vunpack.i.l.bf16 %v1483_v22 }
  0xcb   : > { %1290 = vmatprep.subr.bf16.mxu0 %v1289_v23  ;;  %v441_v26 = vsel %vm440_vm7, %v1479_v21, %v1469_v11  ;;  %v443_v27 = vsel %vm440_vm7, %v1470_v10, %v1480_v20 }
  0xcc   : > { %v487_v28 = vpop.permute.xlu0 %486  ;;  %v467_v29 = vsel %vm466_vm8, %v1484_v25, %v1474_v16  ;;  %v469_v30 = vsel %vm466_vm8, %v1475_v15, %v1485_v24 }
  0xcd   : > { %v489_v31 = vpop.permute.xlu1 %488  ;;  %v1291_v32 = vpack.c.bf16 %v467_v29, %v441_v26  ;;  %v1303_v33 = vpack.c.bf16 %v469_v30, %v443_v27 }
  0xce   : > { %v494_v34 = vsel %vm492_vm9, %v487_v28, %v489_v31 }
  0xcf   : > { %1292 = vmatpush1.bf16.msra.mxu0 %v1291_v32  ;;  %1304 = vmatpush3.bf16.msra.mxu1 %v1303_v33 }
  0xd0   : > { %556 = vmatprep.subr.mxu0 %v494_v34  ;;  %v485_v35 = vpop.permute.xlu0 %484  ;;  %1249 = vmatprep.subr.mxu1 %v1674_v7 }
  0xd1   : > { %v491_v36 = vpop.permute.xlu1 %490  ;;  %v493_v37 = vsel %vm492_vm9, %v485_v35, %v487_v28 }
  0xd2   : > { %v495_v39 = vsel %vm492_vm9, %v489_v31, %v491_v36 }
  0xd3   : > { %557 = vmatpush1.msra.mxu0 %v493_v37  ;;  %1250 = vmatpush3.msra.mxu1 %v495_v39 }
  0xd4   : > { %1204 = vmatmul.mubr.msk.f32.vlgmr.msra.gmra.mrb[0].mxu0 %vm536_vm10, %v505_v38  ;;  %1252 = vmatmul.mubr.msk.f32.vlgmr.msra.gmra.mrb[0].mxu1 %vm536_vm10, %v505_v38 }
  0xd5   : > { %1325 = vmatprep.subr.bf16.mxu1 %v1666_v0  ;;  %1028 = vmatprep.mubr.f32.mxu0 %v1674_v7 }
  0xd6   : > { %1274 = vmatprep.mubr.msk.f32.mxu1 %vm1676_vm0, %v1674_v7  ;;  %vm960_vm0 = vcmask 654336  }
  0xe1   : > { %v534_v43 = vpop.permute.xlu0 %533 }
 0x1a7   : > { %v606_v45 = vpop.f32.mrb[0].mxu0  ;;  %v677_v46 = vpop.f32.mrb[0].mxu1 }
 0x1a8   : > { %v678_v47 = vadd.f32 %v677_v46, %v534_v43  ;;  %v608_v49 = vpop.f32.mrb[1].mxu0  ;;  %v1253_v50 = vpop.f32.mrb[1].mxu1  ;;  %v607_v53 = vadd.f32 %v606_v45, %v534_v43 }
 0x1a9   : > { %v609_v55 = vadd.f32 %v608_v49, %v534_v43 }
 0x1aa   : > { %v683_v54 = vmax.f32 %v678_v47, 0.0  ;;  %v681_v60 = vmax.f32 %v607_v53, 0.0 }
 0x1ab   : > { %v682_v61 = vmax.f32 %v609_v55, 0.0 }
 0x1ac   : > { %v1896_v56 = vmul.f32 %v697_v48, %v683_v54  ;;  %v1900_v63 = vmul.f32 %v689_v57, %v681_v60 }
 0x1ad   : > { %v1902_v1 = vmul.f32 %v693_v59, %v682_v61 }
 0x1ae   : > { %v1492_v62 = vpack.i.bf16 %v1896_v56, %v1674_v7  ;;  %v1532_v3 = vpack.i.bf16 %v1674_v7, %v1900_v63  ;;  %v954_v7 = vld [vmem:[%s2013_s4] sm:$0xff] }
 0x1af   : > { %v1517_v2 = vpack.i.bf16 %v1902_v1, %v1900_v63  ;;  %v1537_v6 = vpack.i.bf16 %v1896_v56, %v1902_v1 }
 0x1b0   : > { %1493 = vrot.lane.b32.xlu1 %v1492_v62, %s1679_s20  ;;  %1488 = vrot.lane.b32.xlu0 %v1492_v62, %s1680_s12 }
 0x1b4   : > { %1503 = vrot.lane.b32.xlu1 %v1492_v62, %s1681_s13  ;;  %1498 = vrot.lane.b32.xlu0 %v1492_v62, %s1682_s11 }
 0x1b8   : > { %1518 = vrot.lane.b32.xlu0 %v1517_v2, %s1682_s11  ;;  %1508 = vrot.lane.b32.xlu1 %v1517_v2, %s1680_s12  ;;  %s1965_s12 = scalar_lea.hbm %s2015_s6, %s1341_s28  ;;  %s1684_s11 = smov [#allocation7]  }
 0x1bc   : > { %1533 = vrot.lane.b32.xlu0 %v1532_v3, %s1667_s16  ;;  %1513 = vrot.lane.b32.xlu1 %v1517_v2, %s1679_s20 }
 0x1c0   : > { %1538 = vrot.lane.b32.xlu0 %v1537_v6, %s1683_s14  ;;  %1523 = vrot.lane.b32.xlu1 %v1517_v2, %s1681_s13 }
 0x1c4   : > { %1543 = vrot.lane.b32.xlu0 %v1537_v6, %s1667_s16  ;;  %1528 = vrot.lane.b32.xlu1 %v1532_v3, %s1683_s14  ;;  %s1601_s14 = sshll.u32 %s1684_s11, 4  ;;  %s1602_s14 = int_to_ptr.vmem [resolvable:$false] %s1601_s14 }
 0x1c5   : > { %s1603_s15 = scalar_lea.vmem %s1602_s14, 768 }
 0x1c8   : > { %1558 = vrot.lane.b32.xlu0 %v1537_v6, %s1669_s8  ;;  %1548 = vrot.lane.b32.xlu1 %v1537_v6, %s1668_s18 }
 0x1cc   : > { %957 = vperm.xlu0 %1486, %v954_v7   ;;  %1553 = vrot.lane.b32.xlu1 %v1532_v3, %s1668_s18 }
 0x1d0   : > { %1563 = vrot.lane.b32.xlu1 %v1532_v3, %s1669_s8  ;;  %s1340_s8 = smul.u32 24, %s1825_s26 }
 0x1d2   : > { %s267_s29 = scalar_lea.vmem [#allocation7], %s1340_s8 }
 0x1d3   : > { %s1126_s7 = sshll.u32 %s267_s29, 4  ;;  %s1967_s7 = int_to_ptr.vmem [resolvable:$true] %s1126_s7 }
 0x1d4   : > { %s1597_s13 = scalar_lea.vmem %s1967_s7, 384  ;;  %p1604_p7 = scmp.lt.s32.totalorder %s1967_s7, %s1602_s14 }
 0x1d5   : > { %p1598_p6 = scmp.ne.s32.totalorder %s1967_s7, %s1597_s13  ;;  %p1605_p10 = scmp.lt.s32.totalorder %s1603_s15, %s1597_s13 }
 0x1d7   : > { %p1599_p12 = pnand %p1598_p6, %p2024_p11  ;;  %p1606_p2 = por %p1605_p10, %p1604_p7 }
 0x1d9   : > { %p1600_p13 = pneg %p1599_p12 }
 0x1db   : > { %p1607_p4 = pnand %p1606_p2, %p1600_p13 }
 0x222   : > { %v1494_v8 = vpop.permute.xlu1 %1493  ;;  %v1489_v9 = vpop.permute.xlu0 %1488 }
 0x223   : > { %v1496_v16 = vunpack.i.h.bf16 %v1494_v8  ;;  %v1495_v17 = vunpack.i.l.bf16 %v1494_v8  ;;  %v1491_v18 = vunpack.i.h.bf16 %v1489_v9  ;;  %v1490_v19 = vunpack.i.l.bf16 %v1489_v9 }
 0x226   : > { %v1504_v10 = vpop.permute.xlu1 %1503  ;;  %v1499_v11 = vpop.permute.xlu0 %1498 }
 0x227   : > { %v1506_v20 = vunpack.i.h.bf16 %v1504_v10  ;;  %v1505_v23 = vunpack.i.l.bf16 %v1504_v10  ;;  %v1501_v24 = vunpack.i.h.bf16 %v1499_v11  ;;  %v1500_v35 = vunpack.i.l.bf16 %v1499_v11 }
 0x22a   : > { %v1519_v12 = vpop.permute.xlu0 %1518  ;;  %v1509_v13 = vpop.permute.xlu1 %1508 }
 0x22b   : > { %v1511_v14 = vunpack.i.h.bf16 %v1509_v13  ;;  %v1510_v15 = vunpack.i.l.bf16 %v1509_v13  ;;  %v1521_v27 = vunpack.i.h.bf16 %v1519_v12  ;;  %v1520_v28 = vunpack.i.l.bf16 %v1519_v12 }
 0x22d   : > { %v728_v29 = vsel %vm725_vm12, %v1511_v14, %v1491_v18  ;;  %v726_v30 = vsel %vm725_vm12, %v1490_v19, %v1510_v15  ;;  %v727_v33 = vsel %vm725_vm12, %v1510_v15, %v1511_v14  ;;  %v780_v45 = vsel %vm777_vm11, %v1521_v27, %v1501_v24 }
 0x22e   : > { %v1919_v21 = vpop.permute.xlu0 %1533  ;;  %v1514_v22 = vpop.permute.xlu1 %1513  ;;  %v778_v46 = vsel %vm777_vm11, %v1500_v35, %v1520_v28  ;;  %v779_v47 = vsel %vm777_vm11, %v1520_v28, %v1521_v27 }
 0x22f   : > { %v1516_v25 = vunpack.i.h.bf16 %v1514_v22  ;;  %v1515_v26 = vunpack.i.l.bf16 %v1514_v22 }
 0x231   : > { %v754_v31 = vsel %vm751_vm13, %v1516_v25, %v1496_v16  ;;  %v752_v32 = vsel %vm751_vm13, %v1495_v17, %v1515_v26  ;;  %v753_v34 = vsel %vm751_vm13, %v1515_v26, %v1516_v25  ;;  %v1535_v17 = vunpack.i.l.bf16 %v1919_v21 }
 0x232   : > { %v1307_v36 = vpack.c.bf16 %v752_v32, %v726_v30  ;;  %v1326_v37 = vpack.c.bf16 %v754_v31, %v728_v29  ;;  %v1539_v38 = vpop.permute.xlu0 %1538  ;;  %v1524_v39 = vpop.permute.xlu1 %1523  ;;  %v1305_v40 = vpack.c.bf16 %v753_v34, %v727_v33 }
 0x233   : > { %v1541_v41 = vunpack.i.h.bf16 %v1539_v38  ;;  %v1540_v42 = vunpack.i.l.bf16 %v1539_v38  ;;  %v1526_v43 = vunpack.i.h.bf16 %v1524_v39  ;;  %v1525_v44 = vunpack.i.l.bf16 %v1524_v39 }
 0x234   : > { %1306 = vmatprep.subr.bf16.mxu0 %v1305_v40  ;;  %1327 = vmatpush3.bf16.msra.mxu1 %v1326_v37 }
 0x235   : > { %v806_v48 = vsel %vm803_vm14, %v1526_v43, %v1506_v20  ;;  %v804_v49 = vsel %vm803_vm14, %v1505_v23, %v1525_v44  ;;  %1308 = vmatpush1.bf16.msra.mxu0 %v1307_v36  ;;  %1328 = vmatprep.subr.bf16.mxu1 %v1666_v0  ;;  %v805_v50 = vsel %vm803_vm14, %v1525_v44, %v1526_v43 }
 0x236   : > { %v1329_v51 = vpack.c.bf16 %v806_v48, %v780_v45  ;;  %v1311_v52 = vpack.c.bf16 %v804_v49, %v778_v46  ;;  %v1544_v53 = vpop.permute.xlu0 %1543  ;;  %v1529_v54 = vpop.permute.xlu1 %1528  ;;  %v1309_v55 = vpack.c.bf16 %v805_v50, %v779_v47  ;;  %v837_v57 = vsel %vm835_vm15, %v1540_v42, %v1541_v41 }
 0x237   : > { %v1531_v59 = vunpack.i.h.bf16 %v1529_v54  ;;  %v1530_v60 = vunpack.i.l.bf16 %v1529_v54  ;;  %v1313_v61 = vpack.c.bf16 %v837_v57, %v1902_v1  ;;  %v1546_v62 = vunpack.i.h.bf16 %v1544_v53 }
 0x238   : > { %1310 = vmatprep.subr.bf16.mxu0 %v1309_v55  ;;  %1330 = vmatpush3.bf16.msra.mxu1 %v1329_v51  ;;  %v1545_v2 = vunpack.i.l.bf16 %v1544_v53 }
 0x239   : > { %v838_v3 = vsel %vm835_vm15, %v1541_v41, %v1531_v59  ;;  %v836_v6 = vsel %vm835_vm15, %v1530_v60, %v1540_v42  ;;  %1312 = vmatpush1.bf16.msra.mxu0 %v1311_v52  ;;  %1331 = vmatprep.subr.bf16.mxu1 %v1666_v0 }
 0x23a   : > { %v1332_v7 = vpack.c.bf16 %v838_v3, %v1896_v56  ;;  %v1315_v8 = vpack.c.bf16 %v836_v6, %v1900_v63  ;;  %v1559_v9 = vpop.permute.xlu0 %1558  ;;  %v1549_v10 = vpop.permute.xlu1 %1548  ;;  %1314 = vmatprep.subr.bf16.mxu0 %v1313_v61  ;;  %v862_v14 = vsel %vm284_vm1, %v1545_v2, %v1546_v62  ;;  %v1536_v63 = vunpack.i.h.bf16 %v1919_v21 }
 0x23b   : > { %v1551_v11 = vunpack.i.h.bf16 %v1549_v10  ;;  %v1550_v12 = vunpack.i.l.bf16 %v1549_v10  ;;  %v1561_v13 = vunpack.i.h.bf16 %v1559_v9  ;;  %v1560_v1 = vunpack.i.l.bf16 %v1559_v9 }
 0x23c   : > { %1333 = vmatpush3.bf16.msra.mxu1 %v1332_v7  ;;  %v861_v22 = vsel %vm284_vm1, %v1535_v17, %v1545_v2  ;;  %v863_v23 = vsel %vm284_vm1, %v1546_v62, %v1536_v63 }
 0x23d   : > { %1316 = vmatpush1.bf16.msra.mxu0 %v1315_v8  ;;  %v887_v15 = vsel %vm310_vm2, %v1550_v12, %v1551_v11  ;;  %1334 = vmatprep.subr.bf16.mxu1 %v1666_v0  ;;  %v912_v20 = vsel %vm336_vm3, %v1560_v1, %v1561_v13 }
 0x23e   : > { %v1554_v56 = vpop.permute.xlu1 %1553  ;;  %v1317_v16 = vpack.c.bf16 %v887_v15, %v862_v14  ;;  %v1321_v21 = vpack.c.bf16 %v1860_v58, %v912_v20  ;;  %v923_v58 = vld [vmem:[%s2011_s2] sm:$0xff] }
 0x23f   : > { %v1556_v18 = vunpack.i.h.bf16 %v1554_v56  ;;  %v1555_v19 = vunpack.i.l.bf16 %v1554_v56 }
 0x240   : > { %1318 = vmatprep.subr.bf16.mxu0 %v1317_v16 }
 0x241   : > { %v886_v24 = vsel %vm310_vm2, %v1555_v19, %v1550_v12  ;;  %v888_v25 = vsel %vm310_vm2, %v1551_v11, %v1556_v18 }
 0x242   : > { %v1319_v26 = vpack.c.bf16 %v886_v24, %v861_v22  ;;  %v1335_v27 = vpack.c.bf16 %v888_v25, %v863_v23  ;;  %v1564_v28 = vpop.permute.xlu1 %1563 }
 0x243   : > { %v1566_v29 = vunpack.i.h.bf16 %v1564_v28  ;;  %v1565_v30 = vunpack.i.l.bf16 %v1564_v28 }
 0x244   : > { %1320 = vmatpush1.bf16.msra.mxu0 %v1319_v26  ;;  %1336 = vmatpush3.bf16.msra.mxu1 %v1335_v27 }
 0x245   : > { %v913_v31 = vsel %vm336_vm3, %v1561_v13, %v1566_v29  ;;  %v911_v32 = vsel %vm336_vm3, %v1565_v30, %v1560_v1  ;;  %1322 = vmatprep.subr.bf16.mxu0 %v1321_v21  ;;  %1337 = vmatprep.subr.bf16.mxu1 %v1666_v0 }
 0x246   : > { %v1338_v33 = vpack.c.bf16 %v1869_v5, %v913_v31  ;;  %v1323_v34 = vpack.c.bf16 %v1866_v4, %v911_v32 }
 0x248   : > { %1324 = vmatpush1.bf16.msra.mxu0 %v1323_v34  ;;  %1339 = vmatpush3.bf16.msra.mxu1 %v1338_v33 }
 0x24b   : > { %1206 = vmatmul.mubr.msk.f32.vlgmr.msra.gmra.mrb[2].mxu0 %vm960_vm0, %v923_v58  ;;  %1275 = vmatmul.mubr.msk.f32.vlgmr.msra.gmra.mrb[2].mxu1 %vm960_vm0, %v923_v58  ;;  %v958_v35 = vpop.permute.xlu0 %957 }
 0x31e   : > { %v1030_v36 = vpop.f32.mrb[2].mxu0  ;;  %v1101_v37 = vpop.f32.mrb[2].mxu1 }
 0x31f   : > { %v1031_v0 = vadd.f32 %v1030_v36, %v958_v35  ;;  %v1102_v38 = vadd.f32 %v1101_v37, %v958_v35  ;;  %v1032_v5 = vpop.f32.mrb[3].mxu0  ;;  %v1276_v4 = vpop.f32.mrb[3].mxu1 }
 0x320   : > { %v1033_v39 = vadd.f32 %v1032_v5, %v958_v35 }
 0x321   : > { %v1105_v40 = vmax.f32 %v1031_v0, 0.0  ;;  %v1107_v41 = vmax.f32 %v1102_v38, 0.0 }
 0x322   : > { %v1106_v42 = vmax.f32 %v1033_v39, 0.0 }
 0x323   : > { %1108 = vst [vmem:[%s267_s29] sm:$0xff] %v1105_v40  ;;  %1110 = vst [vmem:[%s267_s29 + $0x10] sm:$0xff] %v1107_v41 }
 0x324   : > { %1109 = vst [vmem:[%s267_s29 + $0x8] sm:$0xff] %v1106_v42 }
 0x325   : > { %1610 = shalt.err (!%p1607_p4)
}
 0x326   : > { %s1611_s26 = scalar_lea.hbm %s1965_s12, 384  ;;  %s1615_s18 = scalar_lea.hbm %s2015_s6, 768 }
 0x327   : > { %p1612_p5 = scmp.ne.s32.totalorder %s1965_s12, %s1611_s26  ;;  %p1616_p0 = scmp.lt.u32.totalorder %s1965_s12, %s2015_s6 }
 0x328   : > { %p1617_p1 = scmp.lt.u32.totalorder %s1615_s18, %s1611_s26  ;;  %p1619_p6 = scmp.lt.u32.totalorder %s1611_s26, %s1965_s12 }
 0x329   : > { %p1613_p8 = pnand %p1612_p5, %p2024_p11 }
 0x32a   : > { %p1618_p3 = por %p1617_p1, %p1616_p0 }
 0x32b   : > { %p1614_p9 = pneg %p1613_p8 }
 0x32c   : > { %p1620_p12 = por %p1619_p6, %p1618_p3 }
 0x32e   : > { %p1621_p13 = pnand %p1620_p12, %p1614_p9 }
 0x330   : > { %1624 = shalt.err (!%p1621_p13)
}
 0x331   : > { %1344 = dma.vmem_to_hbm [thread:$0]  (%p2024_p11), %s1967_s7, 384, %s1965_s12, %s1112_s25  }
 0x332 PF: > { %s1138_s29 = sand.u32 1, %s1651_s21   ;;  %p2025_p7 = scmp.ne.s32.totalorder %s2020_s10, 0 }
 0x333   : > { %p2026_p10 = scmp.ge.s32.totalorder %s1663_s24, 2  ;;  %s1139_s19 = scalar_lea.sflag [#allocation6], %s1138_s29 }
 0x335   : > { %p1351_p2 = pnand %p2026_p10, %p2025_p7 }
 0x337   : > { %1646 = dma.done.wait (!%p1351_p2), %s1139_s19, 384  }
 0x338   : > { %1648 = vsyncadd (!%p1351_p2), %s1139_s19, 4294966912  ;;  %p19_p4 = scmp.ge.s32.totalorder %s1745_s27, 4   ;;  %s2027_s21 = smov %s1655_s22 }
 0x339   : > { %s2028_s22 = smov %s1659_s23  ;;  %s2029_s23 = smov %s1757_s30 }
 0x33a   : > { %s2030_s24 = smov %s1745_s27  ;;  %21 = sbr.rel (!%p19_p4) target bundleno = 5 (0x5), region = 89 }
 0x341   :  { %1144 = vsyncpa [#allocation5], 1 }
 0x342   :  { %1146 = vsyncpa [#allocation5 + $0x1], 1 }
 0x343   :  { %1147 = vsyncpa [#allocation6], 1 }
 0x344   :  { %1149 = vsyncpa [#allocation6 + $0x1], 1 }

</bundles_post_ra>
